<compile_context>
chip_gen: v6e
topology: v6e:2x2x1
jax: 0.10.0
libtpu: 0.0.40
codegen_flags: <defaults>
</compile_context>

<pallas_src>
import jax
import jax.numpy as jnp
from jax.experimental import pallas as pl
from jax.experimental.pallas import tpu as pltpu


def _custom_layernorm_kernel(x_ref, w_ref, o_ref):
    # x_ref: (1, C, T)   w_ref: (C, 1)   o_ref: (1, C, T)
    x = x_ref[0].astype(jnp.float32)               # (C, T)
    c = x.shape[0]

    # Single-pass moments over the channel (sublane) axis.
    s1 = jnp.sum(x, axis=0, keepdims=True)         # (1, T)
    s2 = jnp.sum(x * x, axis=0, keepdims=True)     # (1, T)
    # Unbiased variance (correction=1), matching torch.var(..., correction=1).
    var = (s2 - s1 * s1 / c) / (c - 1)
    inv = jax.lax.rsqrt(var + jnp.float32(1e-5))   # (1, T)

    w = w_ref[...].astype(jnp.float32)             # (C, 1) — per-channel conv weight
    o_ref[0] = (x * inv * w).astype(o_ref.dtype)   # (C,T)*(1,T)*(C,1) -> (C,T)


def custom_layer_norm(x_nchw, weight):
    """x_nchw: (N, C, H, W); weight: (C,) — per-channel scale of the grouped 1x1 conv."""
    n, c, h, w = x_nchw.shape
    hw = h * w
    x3 = x_nchw.reshape(n, c, hw)                  # free reshape (no transpose)
    itemsize = jnp.dtype(x3.dtype).itemsize

    # Lane-dense tile along HW. Cap per-block bytes so double-buffered input+output
    # (2 arrays x 2 buffers x block) stays well inside scoped VMEM on every
    # generation (v5e 16 MiB default, v6e 32 MiB, v7x 32 MiB scoped / 64 MiB phys).
    target_block_bytes = 2 * 1024 * 1024
    tile_hw = (target_block_bytes // max(c * itemsize, 1)) // 128 * 128
    tile_hw = max(128, min(tile_hw, pl.cdiv(hw, 128) * 128))

    grid = (n, pl.cdiv(hw, tile_hw))

    w2d = weight.reshape(c, 1).astype(x3.dtype)

    out3 = pl.pallas_call(
        _custom_layernorm_kernel,
        out_shape=jax.ShapeDtypeStruct((n, c, hw), x3.dtype),
        grid_spec=pltpu.PrefetchScalarGridSpec(
            num_scalar_prefetch=0,
            grid=grid,
            in_specs=[
                pl.BlockSpec((1, c, tile_hw), lambda b, i: (b, 0, i)),
                pl.BlockSpec((c, 1), lambda b, i: (0, 0)),
            ],
            out_specs=pl.BlockSpec((1, c, tile_hw), lambda b, i: (b, 0, i)),
        ),
        compiler_params=pltpu.CompilerParams(
            dimension_semantics=("parallel", "parallel"),
            vmem_limit_bytes=32 * 1024 * 1024,
        ),
    )(x3, w2d)

    return out3.reshape(n, c, h, w)


def _reference(x_nchw, weight):
    x = x_nchw.astype(jnp.float32)
    var = jnp.var(x, axis=1, keepdims=True, ddof=1)
    xn = x / jnp.sqrt(var + 1e-5)
    return xn * weight.reshape(1, -1, 1, 1)


if __name__ == "__main__":
    key = jax.random.PRNGKey(0)
    kx, kw, kx2 = jax.random.split(key, 3)

    # Primary small test (matches the module's intended use): N=2, C=4, 16x16 spatial.
    N, C, H, W = 2, 4, 16, 16
    x = jax.random.normal(kx, (N, C, H, W), dtype=jnp.float32)
    # Deterministic synthetic init for Conv2d(C, C, 1, groups=C, bias=False) weight (C,1,1,1)->(C,)
    weight = jax.random.uniform(kw, (C,), dtype=jnp.float32, minval=-0.5, maxval=0.5)

    out = custom_layer_norm(x, weight)
    out = jax.block_until_ready(out)
    ref = _reference(x, weight)
    assert out.shape == (N, C, H, W)
    assert jnp.allclose(out, ref, atol=1e-4, rtol=1e-4), "mismatch vs reference"

    # Non-128-divisible spatial extent: exercises the cdiv / partial-tile path.
    x2 = jax.random.normal(kx2, (1, C, 10, 10), dtype=jnp.float32)
    out2 = jax.block_until_ready(custom_layer_norm(x2, weight))
    ref2 = _reference(x2, weight)
    assert jnp.allclose(out2, ref2, atol=1e-4, rtol=1e-4), "mismatch vs reference (ragged HW)"

    print("KERNEL_OK")
</pallas_src>

<mosaic_0001>
module attributes {stable_mosaic.version = 11 : i64} {
  func.func @_custom_layernorm_kernel(%arg0: i32, %arg1: i32, %arg2: memref<1x4x256xf32, #tpu.memory_space<vmem>>, %arg3: memref<4x1xf32, #tpu.memory_space<vmem>>, %arg4: memref<1x4x256xf32, #tpu.memory_space<vmem>>) attributes {dimension_semantics = [#tpu.dimension_semantics<parallel>, #tpu.dimension_semantics<parallel>], iteration_bounds = array<i64: 2, 1>, scalar_prefetch = 0 : i64, scratch_operands = 0 : i64, tpu.core_type = #tpu.core_type<tc>, window_params = [{transform_indices = @transform_0, window_bounds = array<i64: 1, 4, 256>}, {pipeline_mode = #tpu.pipeline_mode<synchronous>, transform_indices = @transform_1, window_bounds = array<i64: 4, 1>}, {transform_indices = @transform_2, window_bounds = array<i64: 1, 4, 256>}]} {
    %c0 = arith.constant 0 : index
    %c0_0 = arith.constant 0 : index
    %c0_1 = arith.constant 0 : index
    %0 = vector.load %arg2[%c0, %c0_0, %c0_1] : memref<1x4x256xf32, #tpu.memory_space<vmem>>, vector<1x4x256xf32>
    %1 = vector.shape_cast %0 : vector<1x4x256xf32> to vector<4x256xf32>
    %cst = arith.constant dense<0.000000e+00> : vector<256xf32>
    %2 = vector.multi_reduction <add>, %1, %cst [0] : vector<4x256xf32> to vector<256xf32>
    %3 = vector.shape_cast %2 : vector<256xf32> to vector<1x256xf32>
    %4 = arith.mulf %1, %1 : vector<4x256xf32>
    %cst_2 = arith.constant dense<0.000000e+00> : vector<256xf32>
    %5 = vector.multi_reduction <add>, %4, %cst_2 [0] : vector<4x256xf32> to vector<256xf32>
    %6 = vector.shape_cast %5 : vector<256xf32> to vector<1x256xf32>
    %7 = arith.mulf %3, %3 : vector<1x256xf32>
    %cst_3 = arith.constant 4.000000e+00 : f32
    %8 = vector.broadcast %cst_3 : f32 to vector<1x256xf32>
    %9 = arith.divf %7, %8 : vector<1x256xf32>
    %10 = arith.subf %6, %9 : vector<1x256xf32>
    %cst_4 = arith.constant 3.000000e+00 : f32
    %11 = vector.broadcast %cst_4 : f32 to vector<1x256xf32>
    %12 = arith.divf %10, %11 : vector<1x256xf32>
    %cst_5 = arith.constant 9.99999974E-6 : f32
    %13 = vector.broadcast %cst_5 : f32 to vector<1x256xf32>
    %14 = arith.addf %12, %13 : vector<1x256xf32>
    %15 = math.rsqrt %14 : vector<1x256xf32>
    %c0_6 = arith.constant 0 : index
    %c0_7 = arith.constant 0 : index
    %16 = vector.load %arg3[%c0_6, %c0_7] : memref<4x1xf32, #tpu.memory_space<vmem>>, vector<4x1xf32>
    %17 = vector.broadcast %15 : vector<1x256xf32> to vector<4x256xf32>
    %18 = arith.mulf %1, %17 : vector<4x256xf32>
    %19 = vector.broadcast %16 : vector<4x1xf32> to vector<4x256xf32>
    %20 = arith.mulf %18, %19 : vector<4x256xf32>
    %c0_8 = arith.constant 0 : index
    %c0_9 = arith.constant 0 : index
    %c0_10 = arith.constant 0 : index
    %21 = vector.load %arg4[%c0_8, %c0_9, %c0_10] : memref<1x4x256xf32, #tpu.memory_space<vmem>>, vector<1x4x256xf32>
    %22 = vector.shape_cast %21 : vector<1x4x256xf32> to vector<4x256xf32>
    %23 = vector.shape_cast %20 : vector<4x256xf32> to vector<1x4x256xf32>
    tpu.vector_store %arg4[%c0_8, %c0_9, %c0_10], %23 {strides = array<i32>} : memref<1x4x256xf32, #tpu.memory_space<vmem>>, vector<1x4x256xf32>,
    return
  }
  func.func @transform_0(%arg0: i32, %arg1: i32) -> (i32, i32, i32) {
    %c0_i32 = arith.constant 0 : i32
    %c0_i32_0 = arith.constant 0 : i32
    return %arg0, %c0_i32, %arg1 : i32, i32, i32
  }
  func.func @transform_1(%arg0: i32, %arg1: i32) -> (i32, i32) {
    %c0_i32 = arith.constant 0 : i32
    %c0_i32_0 = arith.constant 0 : i32
    %c0_i32_1 = arith.constant 0 : i32
    return %c0_i32, %c0_i32_0 : i32, i32
  }
  func.func @transform_2(%arg0: i32, %arg1: i32) -> (i32, i32, i32) {
    %c0_i32 = arith.constant 0 : i32
    %c0_i32_0 = arith.constant 0 : i32
    return %arg0, %c0_i32, %arg1 : i32, i32, i32
  }
}

</mosaic_0001>

<bundles_post_ra>
// kernel: tpu_custom_call.1
= control target key start
LH: loop header
LB: loop body
LE: loop exit
PB: predicated region body
PF: predicated region fallthrough
CT: control target
= control target key end

     0   :  { %7 = vsyncpa [#allocation3], 0  ;;  %s709_s0 = inlined_call_operand.hbm [shape: f32[2,4,256], index: 0, kind: input, shape index: {}]   ;;  %s710_s1 = inlined_call_operand.vmem [shape: f32[4,1], index: 1, kind: input, shape index: {}]   ;;  %s711_s2 = inlined_call_operand.hbm [shape: f32[2,4,256], index: 2, kind: output, shape index: {}]  }
   0x1   :  { %9 = vsyncpa [#allocation3 + $0x1], 0 }
   0x2   :  { %10 = vsyncpa [#allocation4], 0 }
   0x3   :  { %12 = vsyncpa [#allocation4 + $0x1], 0  ;;  %s568_s9 = smov 0   ;;  %s570_s10 = smov 0  }
   0x4   :  { %s572_s11 = smov 0   ;;  %s574_s12 = smov 0  }
   0x5   :  { %s576_s13 = smov 0   ;;  %s578_s14 = smov 0  }
   0x6 LB: > { %s352_s15 = sadd.s32 4294967295, %s547_s14   ;;  %s353_s16 = sadd.s32 4294967294, %s547_s14   ;;  %s547_s14 = sphi %s578_s14, %s18_s14   ;;  %s543_s13 = sphi %s576_s13, %s723_s13   ;;  %s539_s12 = sphi %s574_s12, %s722_s12   ;;  %s535_s11 = sphi %s572_s11, %s721_s11   ;;  %s531_s10 = sphi %s570_s10, %s720_s10   ;;  %s527_s9 = sphi %s568_s9, %s719_s9  }
   0x7   : > { %s30_s17 = sadd.s32 1, %s543_s13  ;;  %s39_s18 = sadd.s32 1, %s535_s11 }
   0x8   : > { %p32_p0 = scmp.ge.s32.totalorder %s30_s17, 2  ;;  %p46_p1 = scmp.ne.s32.totalorder %s535_s11, %s531_s10 }
   0x9   : > { %p47_p2 = scmp.eq.s32.totalorder %s547_s14, 0  ;;  %p52_p3 = scmp.ne.s32.totalorder %s531_s10, %s527_s9 }
   0xa   : > { %s725_s17 = smov (%p32_p0, %s30_s17), 0  ;;  %p53_p5 = scmp.eq.s32.totalorder %s352_s15, 0 }
   0xb   : > { %p609_p4 = por %p47_p2, %p46_p1  ;;  %s34_s20 = ssub.s32 %s543_s13, %s725_s17 }
   0xc   : > { %p99_p6 = scmp.eq.s32.totalorder %s352_s15, 1  ;;  %p37_p7 = scmp.eq.s32.totalorder %s34_s20, 0 }
   0xd   : > { %p615_p8 = por %p53_p5, %p52_p3  ;;  %p105_p10 = scmp.eq.s32.totalorder %s353_s16, 1 }
   0xe   : > { %p619_p9 = por %p99_p6, %p46_p1  ;;  %p381_p13 = scmp.lt.s32.totalorder %s547_s14, 2 }
   0xf   : > { %s624_s23 = scalar_select %p37_p7, %s535_s11, %s39_s18  }
  0x10   : > { %p626_p11 = por %p105_p10, %p52_p3  ;;  %s128_s25 = sand.u32 1, %s535_s11  }
  0x11   : > { %s356_s26 = sshll.u32 %s128_s25, 3  ;;  %s367_s27 = sshll.u32 %s543_s13, 7 }
  0x12   : > { %s715_s24 = scalar_select %p626_p11, 1, 0 }
  0x13   : > { %s140_s30 = scalar_lea.hbm %s709_s0, %s367_s27  ;;  %s132_s3 = scalar_lea.vmem [#allocation2], %s356_s26 }
  0x14   : > { %s142_s4 = sshll.u32 %s132_s3, 4  ;;  %p639_p0 = pnand %p381_p13, %p609_p4  ;;  %s143_s4 = int_to_ptr.vmem [resolvable:$true] %s142_s4 }
  0x15   : > { %p359_p1 = scmp.ge.s32.totalorder %s547_s14, 1  ;;  %p147_p2 = scmp.lt.s32.totalorder %s547_s14, 3 }
  0x16   : > { %s129_s6 = scalar_lea.sflag [#allocation3], %s128_s25  ;;  %p441_p3 = pneg %p639_p0 }
  0x17   : > { %s452_s7 = scalar_lea.vmem %s143_s4, 128  ;;  %s549_s8 = smov [#allocation2]  }
  0x18   : > { %p453_p5 = scmp.ne.s32.totalorder %s143_s4, %s452_s7  ;;  %s457_s15 = sshll.u32 %s549_s8, 4  ;;  %s458_s15 = int_to_ptr.vmem [resolvable:$false] %s457_s15 }
  0x19   : > { %s459_s16 = scalar_lea.vmem %s458_s15, 256  ;;  %p460_p10 = scmp.lt.s32.totalorder %s143_s4, %s458_s15 }
  0x1a   : > { %p455_p6 = pnand %p453_p5, %p441_p3  ;;  %p461_p12 = scmp.lt.s32.totalorder %s459_s16, %s452_s7 }
  0x1c   : > { %p456_p7 = pneg %p455_p6  ;;  %p462_p4 = por %p461_p12, %p460_p10 }
  0x1e   : > { %p463_p13 = pnand %p462_p4, %p456_p7 }
  0x20   : > { %466 = shalt.err (!%p463_p13)
}
  0x21   : > { %376 = dma.hbm_to_vmem [thread:$0]  (!%p639_p0), %s140_s30, 128, %s143_s4, %s129_s6  }
  0x22   : > { %p148_p11 = pnand %p359_p1, %p147_p2 }
  0x23   : > { %s654_s18 = sand.u32 (!%p148_p11), 1, %s531_s10  }
  0x24   : > { %151 = sbr.rel (%p148_p11) target bundleno = 185 (0xb9), region = 28  ;;  %s360_s19 = sshll.u32 (!%p148_p11), %s654_s18, 3 }
  0x25   : > { %s154_s20 = scalar_lea.sflag (!%p148_p11), [#allocation3], %s654_s18  ;;  %s157_s25 = scalar_lea.vmem (!%p148_p11), [#allocation2], %s360_s19 }
  0x29   : > { %518 = dma.done.wait (%p615_p8), %s154_s20, 128  }
  0x2a   : > { %520 = vsyncadd (%p615_p8), %s154_s20, 4294967168  ;;  %v550_v0 = vmov 0   ;;  %v231_v1 = vld [vmem:[%s710_s1] sm:$0xf]  ;;  %vm184_vm0 = vcmask 1043456   ;;  %v244_v46 = vlaneseq  ;;  %s368_s21 = sshll.u32 %s539_s12, 7 }
  0x2b   : > { %433 = vset.pattern.permute.xlu0 %v550_v0  ;;  %v180_v2 = vld [vmem:[%s157_s25] sm:$0xff]  ;;  %v551_v44 = vmov 839922192   ;;  %s177_s28 = scalar_lea.vmem [#allocation5], %s360_s19  ;;  %s266_s4 = scalar_lea.hbm %s711_s2, %s368_s21 }
  0x2c   : > { %239 = vperm.xlu0 %433, %v231_v1   ;;  %v182_v3 = vcombine.high %v180_v2, %v180_v2  ;;  %v185_v4 = vsel %vm184_vm0, %v180_v2, 0.0  ;;  %v199_v6 = vmul.f32 %v180_v2, %v180_v2  ;;  %v242_v45 = vunpack.c.l.s4 %v551_v44  ;;  %s268_s29 = sshll.u32 %s177_s28, 4  ;;  %s252_s5 = scalar_lea.sflag [#allocation4], %s654_s18  ;;  %s269_s29 = int_to_ptr.vmem [resolvable:$true] %s268_s29 }
  0x2d   : > { %v186_v7 = vrot.slane %v185_v4, 4  ;;  %v245_v50 = vshrl.u32 %v244_v46, 7  ;;  %s467_s6 = scalar_lea.vmem %s269_s29, 128  ;;  %s552_s7 = smov [#allocation5]  }
  0x2e   : > { %v192_v5 = vsel %vm184_vm0, %v182_v3, 0.0  ;;  %v201_v9 = vcombine.high %v199_v6, %v199_v6  ;;  %v203_v12 = vsel %vm184_vm0, %v199_v6, 0.0  ;;  %v243_v49 = vunpack.c.0.s8 %v242_v45  ;;  %p468_p8 = scmp.ne.s32.totalorder %s269_s29, %s467_s6  ;;  %s471_s8 = sshll.u32 %s552_s7, 4  ;;  %s472_s8 = int_to_ptr.vmem [resolvable:$false] %s471_s8 }
  0x2f   : > { %v193_v8 = vrot.slane %v192_v5, 4  ;;  %v187_v10 = vadd.f32 %v186_v7, %v185_v4  ;;  %v204_v15 = vrot.slane %v203_v12, 4  ;;  %s473_s12 = scalar_lea.vmem %s472_s8, 256  ;;  %p474_p0 = scmp.lt.s32.totalorder %s269_s29, %s472_s8 }
  0x30   : > { %v210_v13 = vsel %vm184_vm0, %v201_v9, 0.0  ;;  %v246_v52 = vsub.s32 %v243_v49, %v245_v50  ;;  %p469_p11 = pnand %p468_p8, %p619_p9  ;;  %p475_p1 = scmp.lt.s32.totalorder %s473_s12, %s467_s6 }
  0x31   : > { %v194_v11 = vadd.f32 %v193_v8, %v192_v5  ;;  %v188_v14 = vrot.slane %v187_v10, 2  ;;  %v211_v17 = vrot.slane %v210_v13, 4  ;;  %v205_v19 = vadd.f32 %v204_v15, %v203_v12 }
  0x32   : > { %p470_p12 = pneg %p469_p11  ;;  %p476_p2 = por %p475_p1, %p474_p0 }
  0x33   : > { %v195_v16 = vrot.slane %v194_v11, 2  ;;  %v189_v18 = vadd.f32 %v188_v14, %v187_v10  ;;  %v212_v21 = vadd.f32 %v211_v17, %v210_v13  ;;  %v206_v23 = vrot.slane %v205_v19, 2 }
  0x34   : > { %p477_p3 = pnand %p476_p2, %p470_p12 }
  0x35   : > { %v196_v20 = vadd.f32 %v195_v16, %v194_v11  ;;  %v190_v22 = vrot.slane %v189_v18, 1  ;;  %v213_v25 = vrot.slane %v212_v21, 2  ;;  %v207_v27 = vadd.f32 %v206_v23, %v205_v19 }
  0x37   : > { %v197_v24 = vrot.slane %v196_v20, 1  ;;  %v191_v26 = vadd.f32 %v190_v22, %v189_v18  ;;  %v214_v29 = vadd.f32 %v213_v25, %v212_v21  ;;  %v208_v30 = vrot.slane %v207_v27, 1 }
  0x39   : > { %v198_v28 = vadd.f32 %v197_v24, %v196_v20  ;;  %v217_v31 = vmul.f32 %v191_v26, %v191_v26  ;;  %v215_v32 = vrot.slane %v214_v29, 1  ;;  %v209_v34 = vadd.f32 %v208_v30, %v207_v27 }
  0x3b   : > { %v218_v33 = vmul.f32 %v198_v28, %v198_v28  ;;  %v220_v35 = vmul.f32 0.25, %v217_v31  ;;  %v216_v36 = vadd.f32 %v215_v32, %v214_v29 }
  0x3d   : > { %v221_v37 = vmul.f32 0.25, %v218_v33  ;;  %v222_v38 = vsub.f32 %v209_v34, %v220_v35 }
  0x3f   : > { %v223_v39 = vsub.f32 %v216_v36, %v221_v37  ;;  %v225_v40 = vmul.f32 0.33333334, %v222_v38 }
  0x41   : > { %v226_v41 = vmul.f32 0.33333334, %v223_v39  ;;  %v227_v42 = vadd.f32 1e-05, %v225_v40 }
  0x43   : > { %v228_v43 = vadd.f32 1e-05, %v226_v41  ;;  %435 = vrsqrt.f32 %v227_v42 }
  0x45   : > { %437 = vrsqrt.f32 %v228_v43 }
  0x50   : > { %v436_v47 = vpop.eup %435 }
  0x52   : > { %v438_v48 = vpop.eup %437 }
  0x53   : > { %v234_v51 = vcombine.low %v436_v47, %v438_v48 }
  0x55   : > { %v236_v53 = vmul.f32 %v234_v51, %v180_v2 }
  0xa7   : > { %v240_v54 = vpop.permute.xlu0 %239 }
  0xa8   : > { %v247_v55 = vrot.slane %v240_v54, %v246_v52 }
  0xaa   : > { %v249_v56 = vmul.f32 %v247_v55, %v236_v53 }
  0xac   : > { %250 = vst [vmem:[%s177_s28] sm:$0xff] %v249_v56 }
  0xad   : > { %480 = shalt.err (!%p477_p3)
}
  0xae   : > { %s481_s15 = scalar_lea.hbm %s266_s4, 128  ;;  %s485_s19 = scalar_lea.hbm %s711_s2, 256 }
  0xaf   : > { %p482_p5 = scmp.ne.s32.totalorder %s266_s4, %s481_s15  ;;  %p486_p10 = scmp.lt.s32.totalorder %s266_s4, %s711_s2 }
  0xb0   : > { %p487_p4 = scmp.lt.s32.totalorder %s485_s19, %s481_s15 }
  0xb1   : > { %p483_p6 = pnand %p482_p5, %p619_p9 }
  0xb2   : > { %p488_p13 = por %p487_p4, %p486_p10 }
  0xb3   : > { %p484_p7 = pneg %p483_p6 }
  0xb5   : > { %p489_p8 = pnand %p488_p13, %p484_p7 }
  0xb7   : > { %492 = shalt.err (!%p489_p8)
}
  0xb8   : > { %371 = dma.vmem_to_hbm [thread:$0]  (%p619_p9), %s269_s29, 128, %s266_s4, %s252_s5  }
  0xb9 PF: > { %s280_s26 = sand.u32 1, %s527_s9   ;;  %p717_p11 = scmp.ne.s32.totalorder %s715_s24, 0 }
  0xba   : > { %p718_p12 = scmp.ge.s32.totalorder %s547_s14, 2  ;;  %s281_s27 = scalar_lea.sflag [#allocation4], %s280_s26 }
  0xbc   : > { %p378_p0 = pnand %p718_p12, %p717_p11 }
  0xbe   : > { %p379_p1 = pneg %p378_p0 }
  0xc0   : > { %522 = dma.done.wait (%p379_p1), %s281_s27, 128  }
  0xc1   : > { %524 = vsyncadd (%p379_p1), %s281_s27, 4294967168  ;;  %s18_s14 = sadd.s32 1, %s547_s14   ;;  %s719_s9 = smov %s531_s10 }
  0xc2   : > { %p15_p2 = scmp.ge.s32.totalorder %s18_s14, 4   ;;  %s720_s10 = smov %s535_s11 }
  0xc3   : > { %s721_s11 = smov %s624_s23  ;;  %s722_s12 = smov %s543_s13 }
  0xc4   : > { %s723_s13 = smov %s725_s17  ;;  %17 = sbr.rel (!%p15_p2) target bundleno = 6 (0x6), region = 73 }
  0xc9   :  { %286 = vsyncpa [#allocation3], 1 }
  0xca   :  { %288 = vsyncpa [#allocation3 + $0x1], 1 }
  0xcb   :  { %289 = vsyncpa [#allocation4], 1 }
  0xcc   :  { %291 = vsyncpa [#allocation4 + $0x1], 1 }

</bundles_post_ra>
